<compile_context>
chip_gen: v6e
topology: v6e:2x2x1
jax: 0.10.0
libtpu: 0.0.40
codegen_flags: <defaults>
</compile_context>

<pallas_src>
import functools
import math

import jax
import jax.numpy as jnp
from jax.experimental import pallas as pl
from jax.experimental.pallas import tpu as pltpu


# Per-operand tile budget. With <=4 tiled operands, each double-buffered by the
# Pallas pipeline, peak VMEM stays around ~16 MiB: safe on v5e/v6e (128 MiB)
# and v7x (64 MiB), within the 32 MiB scoped limit requested below.
_TILE_BYTES = 2 * 1024 * 1024
_MAX_LANE_TILE = 16384                 # lane-dim tile cap (multiple of 128)
_VMEM_LIMIT_BYTES = 32 * 1024 * 1024


def build_positional_encoding_table(d_model: int, max_len: int = 5000) -> jnp.ndarray:
    """Replicates the PyTorch buffer construction: pe has shape [max_len, 1, d_model]."""
    position = jnp.arange(max_len, dtype=jnp.float32)[:, None]              # [max_len, 1]
    div_term = jnp.exp(
        jnp.arange(0, (d_model * 2 + 1) // 2, 2, dtype=jnp.float32)
        * (-math.log(10000.0) / d_model)
    )
    n_even = d_model // 2 + d_model % 2
    n_odd = d_model // 2
    pe = jnp.zeros((max_len, d_model), dtype=jnp.float32)
    pe = pe.at[:, 0::2].set(jnp.sin(position * div_term[:n_even]))
    pe = pe.at[:, 1::2].set(jnp.cos(position * div_term[:n_odd]))
    return pe[:, None, :]                                                    # [max_len, 1, d_model]


# ---------------------------------------------------------------------------
# Kernels
# ---------------------------------------------------------------------------
def _add_pe_kernel(x_ref, pe_ref, o_ref):
    # pe broadcasts over the batch axis in the 3-D path; shapes match in the
    # folded 2-D path.
    o_ref[...] = (x_ref[...] + pe_ref[...]).astype(o_ref.dtype)


def _add_pe_dropout_kernel(x_ref, pe_ref, bits_ref, o_ref, *, threshold, scale):
    y = x_ref[...] + pe_ref[...]
    # Inverted dropout with an integer-threshold compare (no u32->f32 convert).
    keep = bits_ref[...] >= jnp.uint32(threshold)
    o_ref[...] = jnp.where(keep, y * jnp.asarray(scale, y.dtype),
                           jnp.zeros_like(y)).astype(o_ref.dtype)


def _round_down_mult(v: int, m: int) -> int:
    return max(m, (v // m) * m)


# ---------------------------------------------------------------------------
# Wrapper
# ---------------------------------------------------------------------------
def positional_encoding(x, pe, *, dropout_p=0.1, training=False, rng_key=None,
                        donate_x=False):
    """x: [S, B, D] (f32 or bf16), pe: [max_len, 1, D] f32.  Returns [S, B, D]."""
    S, B, D = x.shape
    assert pe.shape[0] >= S and pe.shape[2] == D, "pe table too small / wrong d_model"
    pe_slice = pe[:S]                                   # [S, 1, D]
    itemsize = jnp.dtype(x.dtype).itemsize

    use_dropout = bool(training) and dropout_p > 0.0
    if use_dropout:
        assert 0.0 < dropout_p < 1.0, "dropout_p must be in [0, 1)"
        assert rng_key is not None, "training=True needs rng_key"

    if D % 128 == 0:
        # Lane dim already dense: keep [S, B, D]; pe broadcast over batch inside
        # the kernel, so only S*D pe elements are read from HBM.
        bytes_per_brow = D * itemsize
        if B * bytes_per_brow <= _TILE_BYTES:
            tB = B
        else:
            tB = min(B, _round_down_mult(_TILE_BYTES // bytes_per_brow, 8))
        tS = max(1, min(S, _TILE_BYTES // (tB * bytes_per_brow)))
        grid = (pl.cdiv(S, tS), pl.cdiv(B, tB))
        x_spec = pl.BlockSpec((tS, tB, D), lambda i, j: (i, j, 0))
        pe_spec = pl.BlockSpec((tS, 1, D), lambda i, j: (i, 0, 0))
        x_work, pe_work = x, pe_slice
    else:
        # Small / non-128-multiple d_model (demo: B=2, D=32): fold batch into
        # the lane dim so stores are lane-dense instead of masked vst.msk on a
        # mostly-padded (8,128) tile.  pe is broadcast over batch in the
        # wrapper to match (cheap: this path is the small-D case).
        N = B * D
        x_work = x.reshape(S, N)
        pe_work = jnp.broadcast_to(pe_slice, (S, B, D)).reshape(S, N)
        tN = N if N <= _MAX_LANE_TILE else _MAX_LANE_TILE        # multiple of 128 or full N
        tS = min(S, _round_down_mult(_TILE_BYTES // max(tN * itemsize, 1), 8))
        grid = (pl.cdiv(S, tS), pl.cdiv(N, tN))
        x_spec = pl.BlockSpec((tS, tN), lambda i, j: (i, j))
        pe_spec = pl.BlockSpec((tS, tN), lambda i, j: (i, j))

    inputs = [x_work, pe_work]
    in_specs = [x_spec, pe_spec]
    flops = x.size
    bytes_accessed = (2 * x.size * itemsize
                      + pe_work.size * jnp.dtype(pe_work.dtype).itemsize)

    if use_dropout:
        threshold = min(int(round(dropout_p * 2.0 ** 32)), 2 ** 32 - 1)
        scale = 1.0 / (1.0 - dropout_p)
        bits = jax.random.bits(rng_key, x_work.shape, dtype=jnp.uint32)
        # TODO(synk): on real TPU, pltpu.prng_seed/prng_random_bits (seeded per
        # grid step with pl.program_id) would avoid this extra HBM read of
        # random bits, but those primitives have no CPU/interpret lowering, so
        # host-generated bits are used for portability.  The dropout stream is
        # only distributionally equivalent to torch.nn.Dropout, not bit-identical.
        kernel = functools.partial(_add_pe_dropout_kernel,
                                   threshold=threshold, scale=scale)
        inputs.append(bits)
        in_specs.append(x_spec)                 # bits tiled exactly like x
        flops = 3 * x.size
        bytes_accessed += bits.size * 4
    else:
        kernel = _add_pe_kernel

    y = pl.pallas_call(
        kernel,
        out_shape=jax.ShapeDtypeStruct(x_work.shape, x.dtype),
        grid=grid,
        in_specs=in_specs,
        out_specs=x_spec,
        compiler_params=pltpu.CompilerParams(
            # every tile is independent -> shard across v7x's 2 TCs
            dimension_semantics=("parallel", "parallel"),
            vmem_limit_bytes=_VMEM_LIMIT_BYTES,
        ),
        cost_estimate=pl.CostEstimate(flops=flops, transcendentals=0,
                                      bytes_accessed=bytes_accessed),
        # Output aliases x only when the caller explicitly donates it.
        input_output_aliases={0: 0} if donate_x else {},
    )(*inputs)

    return y.reshape(S, B, D)


# ---------------------------------------------------------------------------
# Demo / correctness check
# ---------------------------------------------------------------------------
if __name__ == "__main__":
    d_model = 32
    max_len = 64
    seq = 8
    batch = 2
    p = 0.1

    pe = build_positional_encoding_table(d_model, max_len)

    root = jax.random.PRNGKey(0)
    kx, kdrop = jax.random.split(root)
    x = jax.random.normal(kx, (seq, batch, d_model), dtype=jnp.float32)

    # Pure-JAX reference for the eval-mode forward (dropout is identity).
    ref = x + pe[:seq]

    # Eval-mode forward (module.eval() semantics).
    out = positional_encoding(x, pe, dropout_p=p, training=False)
    out = jax.block_until_ready(out)
    assert out.shape == x.shape
    assert jnp.allclose(out, ref, atol=1e-6), "eval-mode mismatch vs reference"

    # Training-mode forward: inverted dropout with in-kernel threshold compare.
    out_tr = positional_encoding(x, pe, dropout_p=p, training=True, rng_key=kdrop)
    out_tr = jax.block_until_ready(out_tr)
    scale = 1.0 / (1.0 - p)
    ok = jnp.logical_or(out_tr == 0.0, jnp.abs(out_tr - ref * scale) < 1e-4)
    assert bool(jnp.all(ok)), "training-mode dropout mismatch"

    print("KERNEL_OK")
</pallas_src>

<mosaic_0001>
module attributes {stable_mosaic.version = 11 : i64} {
  func.func @_add_pe_kernel(%arg0: i32, %arg1: i32, %arg2: memref<8x64xf32, #tpu.memory_space<vmem>>, %arg3: memref<8x64xf32, #tpu.memory_space<vmem>>, %arg4: memref<8x64xf32, #tpu.memory_space<vmem>>) attributes {dimension_semantics = [#tpu.dimension_semantics<parallel>, #tpu.dimension_semantics<parallel>], iteration_bounds = array<i64: 1, 1>, scalar_prefetch = 0 : i64, scratch_operands = 0 : i64, tpu.core_type = #tpu.core_type<tc>, window_params = [{transform_indices = @transform_0, window_bounds = array<i64: 8, 64>}, {transform_indices = @transform_1, window_bounds = array<i64: 8, 64>}, {transform_indices = @transform_2, window_bounds = array<i64: 8, 64>}]} {
    %c0 = arith.constant 0 : index
    %c0_0 = arith.constant 0 : index
    %0 = vector.load %arg2[%c0, %c0_0] : memref<8x64xf32, #tpu.memory_space<vmem>>, vector<8x64xf32>
    %c0_1 = arith.constant 0 : index
    %c0_2 = arith.constant 0 : index
    %1 = vector.load %arg3[%c0_1, %c0_2] : memref<8x64xf32, #tpu.memory_space<vmem>>, vector<8x64xf32>
    %2 = arith.addf %0, %1 : vector<8x64xf32>
    %c0_3 = arith.constant 0 : index
    %c0_4 = arith.constant 0 : index
    %3 = vector.load %arg4[%c0_3, %c0_4] : memref<8x64xf32, #tpu.memory_space<vmem>>, vector<8x64xf32>
    tpu.vector_store %arg4[%c0_3, %c0_4], %2 {strides = array<i32>} : memref<8x64xf32, #tpu.memory_space<vmem>>, vector<8x64xf32>,
    return
  }
  func.func @transform_0(%arg0: i32, %arg1: i32) -> (i32, i32) {
    %c0_i32 = arith.constant 0 : i32
    return %arg0, %arg1 : i32, i32
  }
  func.func @transform_1(%arg0: i32, %arg1: i32) -> (i32, i32) {
    %c0_i32 = arith.constant 0 : i32
    return %arg0, %arg1 : i32, i32
  }
  func.func @transform_2(%arg0: i32, %arg1: i32) -> (i32, i32) {
    %c0_i32 = arith.constant 0 : i32
    return %arg0, %arg1 : i32, i32
  }
}

</mosaic_0001>

<bundles_post_ra>
// kernel: tpu_custom_call.1
= control target key start
LH: loop header
LB: loop body
LE: loop exit
PB: predicated region body
PF: predicated region fallthrough
CT: control target
= control target key end

     0   :  { %7 = vsyncpa [#allocation3], 0  ;;  %s153_s0 = inlined_call_operand.hbm [shape: f32[8,64], index: 0, kind: input, shape index: {}]   ;;  %s154_s1 = inlined_call_operand.hbm [shape: f32[8,64], index: 1, kind: input, shape index: {}]   ;;  %s155_s2 = inlined_call_operand.hbm [shape: f32[8,64], index: 2, kind: output, shape index: {}]  }
   0x1   :  { %8 = vsyncpa [#allocation6], 0 }
   0x2   :  { %9 = vsyncpa [#allocation4], 0  ;;  %s126_s9 = smov [#allocation2]   ;;  %s127_s11 = smov [#allocation5]  }
   0x3   :  { %s16_s10 = sshll.u32 %s126_s9, 4  ;;  %s26_s12 = sshll.u32 %s127_s11, 4  ;;  %s17_s10 = int_to_ptr.vmem [resolvable:$true] %s16_s10  ;;  %s27_s12 = int_to_ptr.vmem [resolvable:$true] %s26_s12 }
   0x4   :  { %s68_s13 = scalar_lea.vmem %s17_s10, 128  ;;  %p73_p1 = scmp.lt.s32.totalorder %s17_s10, %s17_s10 }
   0x5   :  { %p69_p0 = scmp.ne.s32.totalorder %s17_s10, %s68_s13  ;;  %p74_p2 = scmp.lt.s32.totalorder %s68_s13, %s68_s13 }
   0x7   :  { %p75_p3 = por %p74_p2, %p73_p1 }
   0x9   :  { %p76_p4 = pnand %p75_p3, %p69_p0 }
   0xb   :  { %79 = shalt.err (!%p76_p4)
}
   0xc   :  { %19 = dma.hbm_to_vmem [thread:$0]  %s153_s0, 128, %s17_s10, [#allocation3]  }
   0xd   :  { %s88_s16 = scalar_lea.vmem %s27_s12, 128  ;;  %p93_p6 = scmp.lt.s32.totalorder %s27_s12, %s27_s12 }
   0xe   :  { %p89_p5 = scmp.ne.s32.totalorder %s27_s12, %s88_s16  ;;  %p94_p7 = scmp.lt.s32.totalorder %s88_s16, %s88_s16 }
  0x10   :  { %p95_p8 = por %p94_p7, %p93_p6 }
  0x12   :  { %p96_p9 = pnand %p95_p8, %p89_p5 }
  0x14   :  { %99 = shalt.err (!%p96_p9)
}
  0x15   :  { %29 = dma.hbm_to_vmem [thread:$0]  %s154_s1, 128, %s27_s12, [#allocation6]  }
  0x16   :  { %120 = dma.done.wait [#allocation3], 128  }
  0x17   :  { %121 = vsyncadd [#allocation3], 4294967168 }
  0x18   :  { %122 = dma.done.wait [#allocation6], 128  }
  0x19   :  { %123 = vsyncadd [#allocation6], 4294967168  ;;  %s128_s19 = smov [#allocation7]   ;;  %v36_v0 = vld [vmem:[#allocation2] sm:$0xff]  ;;  %v37_v1 = vld [vmem:[#allocation5] sm:$0xff]  ;;  %vm39_vm0 = vcmask 523264  }
  0x1a   :  { %s47_s20 = sshll.u32 %s128_s19, 4  ;;  %v38_v2 = vadd.f32 %v37_v1, %v36_v0  ;;  %s48_s20 = int_to_ptr.vmem [resolvable:$true] %s47_s20 }
  0x1b   :  { %s100_s0 = scalar_lea.vmem %s48_s20, 128  ;;  %p105_p11 = scmp.lt.s32.totalorder %s48_s20, %s48_s20 }
  0x1c   :  { %40 = vst.msk [vmem:[#allocation7] sm:$0xff] %vm39_vm0, %v38_v2  ;;  %p101_p10 = scmp.ne.s32.totalorder %s48_s20, %s100_s0  ;;  %p106_p12 = scmp.lt.s32.totalorder %s100_s0, %s100_s0 }
  0x1e   :  { %p107_p13 = por %p106_p12, %p105_p11 }
  0x20   :  { %p108_p0 = pnand %p107_p13, %p101_p10 }
  0x22   :  { %111 = shalt.err (!%p108_p0)
}
  0x23   :  { %50 = dma.vmem_to_hbm [thread:$0]  %s48_s20, 128, %s155_s2, [#allocation4]  }
  0x24   :  { %124 = dma.done.wait [#allocation4], 128  }
  0x25   :  { %125 = vsyncadd [#allocation4], 4294967168 }
  0x26   :  { %54 = vsyncpa [#allocation3], 1 }
  0x27   :  { %55 = vsyncpa [#allocation6], 1 }
  0x28   :  { %56 = vsyncpa [#allocation4], 1 }

</bundles_post_ra>
